<compile_context>
chip_gen: v5e
topology: v5e:2x2
jax: 0.10.0
libtpu: 0.0.40
codegen_flags: <defaults>
</compile_context>

<pallas_src>
import functools

import jax
import jax.numpy as jnp
from jax.experimental import pallas as pl
from jax.experimental.pallas import tpu as pltpu

_INV_SQRT2 = 0.7071067811865476


def _dwconv_block_kernel(x_ref, p_ref, o_ref, *, H, W):
    # x_ref: (r_blk, H*W)   flattened (n, c) rows, spatial plane on the lane axis
    # p_ref: (r_blk, 11)    [:,0]=BN scale, [:,1]=BN shift, [:,2:11]=3x3 taps (row-major)
    # o_ref: (r_blk, H*W)
    HW = H * W
    x = x_ref[...]
    p = p_ref[...]

    # Fused inference BatchNorm (per-row affine) + exact-erf GELU (nn.GELU default).
    a = x * p[:, 0:1] + p[:, 1:2]
    a = 0.5 * a * (1.0 + jax.lax.erf(a * _INV_SQRT2))

    # Boundary masks on the flattened plane (implements zero padding = 1).
    pos = jax.lax.broadcasted_iota(jnp.int32, (1, HW), 1)   # flat pixel index
    col = pos % W
    row_ok = {-1: pos >= W, 0: None, 1: pos < (H - 1) * W}
    col_ok = {-1: col >= 1, 0: None, 1: col <= W - 2}

    acc = None
    for dh in (-1, 0, 1):
        for dw in (-1, 0, 1):
            delta = dh * W + dw                              # flat offset of tap (dh, dw)
            if delta == 0:
                shifted = a
            else:
                # shifted[p] = a[p + delta]; wrapped lanes are masked off below.
                shifted = pltpu.roll(a, shift=(-delta) % HW, axis=1)
            m = row_ok[dh]
            if col_ok[dw] is not None:
                m = col_ok[dw] if m is None else jnp.logical_and(m, col_ok[dw])
            if m is not None:
                shifted = jnp.where(m, shifted, 0.0)
            j = 2 + (dh + 1) * 3 + (dw + 1)                  # tap column in the param slab
            term = shifted * p[:, j:j + 1]                   # per-row tap, lane-broadcast
            acc = term if acc is None else acc + term        # first tap initializes acc

    o_ref[...] = acc.astype(o_ref.dtype)


def _vmem_limit_bytes():
    """Generation-aware VMEM limit: ~3/4 of physical VMEM, capped at 96 MiB
    (v5e/v6e: 128 MiB -> 96 MiB; v7x: 64 MiB -> 48 MiB)."""
    try:
        cap = pltpu.get_tpu_info().vmem_capacity_bytes
    except Exception:
        cap = 64 << 20
    return int(min((cap * 3) // 4, 96 << 20))


def _choose_row_block(num_rows, hw, vmem_limit, elem_bytes=4):
    """Rows (= flattened n*c entries) per grid step.  Multiple of 8 (sublane rule)
    unless it is the whole row axis.  Sized so the ~4 double-buffered in/out block
    copies the pipeline keeps live fit comfortably inside the VMEM limit."""
    block_budget = min(vmem_limit // 5, 6 << 20)
    if num_rows * hw * elem_bytes <= block_budget:
        # Everything fits in one block; split in two (multiple of 8) when there is
        # enough work so v7x's two TensorCores both get a block.
        if num_rows >= 16:
            half = ((-(-num_rows // 2)) + 7) // 8 * 8
            if half < num_rows:
                return half
        return num_rows
    cap_rows = (block_budget // (hw * elem_bytes)) // 8 * 8
    return max(8, cap_rows)                                  # last block may be partial


@functools.partial(jax.jit, static_argnames=("eps",))
def dwconv_block(x_nchw, gamma, beta, running_mean, running_var, conv_w, eps=1e-5):
    """x_nchw: (N, C, H, W) float32.  conv_w: (C, 1, 3, 3) PyTorch depthwise layout."""
    N, C, H, W = x_nchw.shape
    HW = H * W
    NC = N * C

    # Fold BN (inference mode) into per-channel scale/shift, merge with the 9 conv taps
    # into a single (N*C, 11) parameter slab -> one small side-DMA per grid step.
    scale = (gamma / jnp.sqrt(running_var + eps)).astype(jnp.float32)
    shift = (beta - running_mean * scale).astype(jnp.float32)
    w9 = conv_w.reshape(C, 9).astype(jnp.float32)            # (C,1,3,3) -> (C,9)
    params = jnp.tile(
        jnp.concatenate([scale[:, None], shift[:, None], w9], axis=1), (N, 1))  # (NC, 11)

    # Free, contiguous reshape (no HBM pass when input is already f32 NCHW).
    x_flat = x_nchw.reshape(NC, HW).astype(jnp.float32)

    vmem_limit = _vmem_limit_bytes()
    r_blk = _choose_row_block(NC, HW, vmem_limit)
    grid = (pl.cdiv(NC, r_blk),)

    kernel = functools.partial(_dwconv_block_kernel, H=H, W=W)
    cost = pl.CostEstimate(
        flops=30 * NC * HW,
        transcendentals=NC * HW,
        bytes_accessed=8 * NC * HW + 4 * NC * 11,
    )

    out_flat = pl.pallas_call(
        kernel,
        out_shape=jax.ShapeDtypeStruct((NC, HW), jnp.float32),
        grid_spec=pltpu.PrefetchScalarGridSpec(
            num_scalar_prefetch=0,
            grid=grid,
            in_specs=[
                pl.BlockSpec((r_blk, HW), lambda i: (i, 0)),
                pl.BlockSpec((r_blk, 11), lambda i: (i, 0)),
            ],
            out_specs=pl.BlockSpec((r_blk, HW), lambda i: (i, 0)),
        ),
        compiler_params=pltpu.CompilerParams(
            dimension_semantics=("parallel",),
            vmem_limit_bytes=vmem_limit,
        ),
        cost_estimate=cost,
    )(x_flat, params)

    # Free reshape back to NCHW.
    return out_flat.reshape(N, C, H, W)


def _reference(x_nchw, gamma, beta, running_mean, running_var, conv_w, eps=1e-5):
    """Plain-JAX reference (BN eval -> exact GELU -> depthwise 3x3 conv, padding=1)."""
    scale = gamma / jnp.sqrt(running_var + eps)
    shift = beta - running_mean * scale
    a = x_nchw * scale[None, :, None, None] + shift[None, :, None, None]
    a = jax.nn.gelu(a, approximate=False)
    return jax.lax.conv_general_dilated(
        a, conv_w,
        window_strides=(1, 1),
        padding=((1, 1), (1, 1)),
        dimension_numbers=("NCHW", "OIHW", "NCHW"),
        feature_group_count=x_nchw.shape[1],
    )


if __name__ == "__main__":
    key = jax.random.PRNGKey(0)
    N, C, H, W = 2, 4, 16, 16

    k_x, k_g, k_b, k_m, k_v, k_w = jax.random.split(key, 6)
    x = jax.random.normal(k_x, (N, C, H, W), dtype=jnp.float32)

    gamma = 1.0 + 0.1 * jax.random.normal(k_g, (C,), dtype=jnp.float32)
    beta = 0.1 * jax.random.normal(k_b, (C,), dtype=jnp.float32)
    running_mean = 0.1 * jax.random.normal(k_m, (C,), dtype=jnp.float32)
    running_var = jnp.abs(jax.random.normal(k_v, (C,), dtype=jnp.float32)) + 0.5
    conv_w = 0.2 * jax.random.normal(k_w, (C, 1, 3, 3), dtype=jnp.float32)

    out = jax.block_until_ready(
        dwconv_block(x, gamma, beta, running_mean, running_var, conv_w))
    ref = _reference(x, gamma, beta, running_mean, running_var, conv_w)

    assert out.shape == (N, C, H, W)
    assert jnp.allclose(out, ref, atol=1e-5, rtol=1e-5), "mismatch vs reference"

    print("KERNEL_OK")
</pallas_src>

<mosaic_0001>
module attributes {stable_mosaic.version = 11 : i64} {
  func.func @_dwconv_block_kernel(%arg0: i32, %arg1: memref<8x256xf32, #tpu.memory_space<vmem>>, %arg2: memref<8x11xf32, #tpu.memory_space<vmem>>, %arg3: memref<8x256xf32, #tpu.memory_space<vmem>>) attributes {dimension_semantics = [#tpu.dimension_semantics<parallel>], iteration_bounds = array<i64: 1>, scalar_prefetch = 0 : i64, scratch_operands = 0 : i64, tpu.core_type = #tpu.core_type<tc>, window_params = [{transform_indices = @transform_0, window_bounds = array<i64: 8, 256>}, {transform_indices = @transform_1, window_bounds = array<i64: 8, 11>}, {transform_indices = @transform_2, window_bounds = array<i64: 8, 256>}]} {
    %c0 = arith.constant 0 : index
    %c0_0 = arith.constant 0 : index
    %0 = vector.load %arg1[%c0, %c0_0] : memref<8x256xf32, #tpu.memory_space<vmem>>, vector<8x256xf32>
    %c0_1 = arith.constant 0 : index
    %c0_2 = arith.constant 0 : index
    %1 = vector.load %arg2[%c0_1, %c0_2] : memref<8x11xf32, #tpu.memory_space<vmem>>, vector<8x11xf32>
    %2 = vector.extract_strided_slice %1 {offsets = [0, 0], sizes = [8, 1], strides = [1, 1]} : vector<8x11xf32> to vector<8x1xf32>
    %3 = vector.broadcast %2 : vector<8x1xf32> to vector<8x256xf32>
    %4 = arith.mulf %0, %3 : vector<8x256xf32>
    %5 = vector.extract_strided_slice %1 {offsets = [0, 1], sizes = [8, 1], strides = [1, 1]} : vector<8x11xf32> to vector<8x1xf32>
    %6 = vector.broadcast %5 : vector<8x1xf32> to vector<8x256xf32>
    %7 = arith.addf %4, %6 : vector<8x256xf32>
    %cst = arith.constant 5.000000e-01 : f32
    %8 = vector.broadcast %cst : f32 to vector<8x256xf32>
    %9 = arith.mulf %8, %7 : vector<8x256xf32>
    %cst_3 = arith.constant 0.707106769 : f32
    %10 = vector.broadcast %cst_3 : f32 to vector<8x256xf32>
    %11 = arith.mulf %7, %10 : vector<8x256xf32>
    %12 = math.erf %11 : vector<8x256xf32>
    %cst_4 = arith.constant 1.000000e+00 : f32
    %13 = vector.broadcast %cst_4 : f32 to vector<8x256xf32>
    %14 = arith.addf %13, %12 : vector<8x256xf32>
    %15 = arith.mulf %9, %14 : vector<8x256xf32>
    %16 = tpu.iota {dimensions = array<i32: 1>} : vector<1x256xi32>
    %c16_i32 = arith.constant 16 : i32
    %c0_i32 = arith.constant 0 : i32
    %17 = arith.cmpi eq, %c16_i32, %c0_i32 : i32
    %c1_i32 = arith.constant 1 : i32
    %18 = arith.select %17, %c1_i32, %c16_i32 : i32
    %19 = vector.broadcast %18 : i32 to vector<1x256xi32>
    %20 = arith.remsi %16, %19 : vector<1x256xi32>
    %c0_i32_5 = arith.constant 0 : i32
    %21 = vector.broadcast %c0_i32_5 : i32 to vector<1x256xi32>
    %22 = arith.cmpi ne, %20, %21 : vector<1x256xi32>
    %c0_i32_6 = arith.constant 0 : i32
    %23 = vector.broadcast %c0_i32_6 : i32 to vector<1x256xi32>
    %24 = arith.cmpi slt, %20, %23 : vector<1x256xi32>
    %c0_i32_7 = arith.constant 0 : i32
    %25 = arith.cmpi slt, %18, %c0_i32_7 : i32
    %26 = vector.broadcast %25 : i1 to vector<1x256xi1>
    %27 = vector.broadcast %26 : vector<1x256xi1> to vector<1x256xi1>
    %28 = arith.xori %24, %27 : vector<1x256xi1>
    %29 = arith.andi %28, %22 : vector<1x256xi1>
    %30 = vector.broadcast %18 : i32 to vector<1x256xi32>
    %31 = arith.addi %20, %30 : vector<1x256xi32>
    %32 = arith.select %29, %31, %20 : vector<1x256xi1>, vector<1x256xi32>
    %c16_i32_8 = arith.constant 16 : i32
    %33 = vector.broadcast %c16_i32_8 : i32 to vector<1x256xi32>
    %34 = arith.cmpi sge, %16, %33 : vector<1x256xi32>
    %c240_i32 = arith.constant 240 : i32
    %35 = vector.broadcast %c240_i32 : i32 to vector<1x256xi32>
    %36 = arith.cmpi slt, %16, %35 : vector<1x256xi32>
    %c1_i32_9 = arith.constant 1 : i32
    %37 = vector.broadcast %c1_i32_9 : i32 to vector<1x256xi32>
    %38 = arith.cmpi sge, %32, %37 : vector<1x256xi32>
    %c14_i32 = arith.constant 14 : i32
    %39 = vector.broadcast %c14_i32 : i32 to vector<1x256xi32>
    %40 = arith.cmpi sle, %32, %39 : vector<1x256xi32>
    %c17_i32 = arith.constant 17 : i32
    %41 = tpu.dynamic_rotate %15 by %c17_i32 dim 1 : vector<8x256xf32>, i32 -> vector<8x256xf32>
    %42 = arith.andi %34, %38 : vector<1x256xi1>
    %cst_10 = arith.constant 0.000000e+00 : f32
    %43 = vector.shape_cast %42 : vector<1x256xi1> to vector<1x256xi1>
    %44 = vector.broadcast %43 : vector<1x256xi1> to vector<8x256xi1>
    %45 = vector.broadcast %cst_10 : f32 to vector<8x256xf32>
    %46 = arith.select %44, %41, %45 : vector<8x256xi1>, vector<8x256xf32>
    %47 = vector.extract_strided_slice %1 {offsets = [0, 2], sizes = [8, 1], strides = [1, 1]} : vector<8x11xf32> to vector<8x1xf32>
    %48 = vector.broadcast %47 : vector<8x1xf32> to vector<8x256xf32>
    %49 = arith.mulf %46, %48 : vector<8x256xf32>
    %c16_i32_11 = arith.constant 16 : i32
    %50 = tpu.dynamic_rotate %15 by %c16_i32_11 dim 1 : vector<8x256xf32>, i32 -> vector<8x256xf32>
    %cst_12 = arith.constant 0.000000e+00 : f32
    %51 = vector.shape_cast %34 : vector<1x256xi1> to vector<1x256xi1>
    %52 = vector.broadcast %51 : vector<1x256xi1> to vector<8x256xi1>
    %53 = vector.broadcast %cst_12 : f32 to vector<8x256xf32>
    %54 = arith.select %52, %50, %53 : vector<8x256xi1>, vector<8x256xf32>
    %55 = vector.extract_strided_slice %1 {offsets = [0, 3], sizes = [8, 1], strides = [1, 1]} : vector<8x11xf32> to vector<8x1xf32>
    %56 = vector.broadcast %55 : vector<8x1xf32> to vector<8x256xf32>
    %57 = arith.mulf %54, %56 : vector<8x256xf32>
    %58 = arith.addf %49, %57 : vector<8x256xf32>
    %c15_i32 = arith.constant 15 : i32
    %59 = tpu.dynamic_rotate %15 by %c15_i32 dim 1 : vector<8x256xf32>, i32 -> vector<8x256xf32>
    %60 = arith.andi %34, %40 : vector<1x256xi1>
    %cst_13 = arith.constant 0.000000e+00 : f32
    %61 = vector.shape_cast %60 : vector<1x256xi1> to vector<1x256xi1>
    %62 = vector.broadcast %61 : vector<1x256xi1> to vector<8x256xi1>
    %63 = vector.broadcast %cst_13 : f32 to vector<8x256xf32>
    %64 = arith.select %62, %59, %63 : vector<8x256xi1>, vector<8x256xf32>
    %65 = vector.extract_strided_slice %1 {offsets = [0, 4], sizes = [8, 1], strides = [1, 1]} : vector<8x11xf32> to vector<8x1xf32>
    %66 = vector.broadcast %65 : vector<8x1xf32> to vector<8x256xf32>
    %67 = arith.mulf %64, %66 : vector<8x256xf32>
    %68 = arith.addf %58, %67 : vector<8x256xf32>
    %c1_i32_14 = arith.constant 1 : i32
    %69 = tpu.dynamic_rotate %15 by %c1_i32_14 dim 1 : vector<8x256xf32>, i32 -> vector<8x256xf32>
    %cst_15 = arith.constant 0.000000e+00 : f32
    %70 = vector.shape_cast %38 : vector<1x256xi1> to vector<1x256xi1>
    %71 = vector.broadcast %70 : vector<1x256xi1> to vector<8x256xi1>
    %72 = vector.broadcast %cst_15 : f32 to vector<8x256xf32>
    %73 = arith.select %71, %69, %72 : vector<8x256xi1>, vector<8x256xf32>
    %74 = vector.extract_strided_slice %1 {offsets = [0, 5], sizes = [8, 1], strides = [1, 1]} : vector<8x11xf32> to vector<8x1xf32>
    %75 = vector.broadcast %74 : vector<8x1xf32> to vector<8x256xf32>
    %76 = arith.mulf %73, %75 : vector<8x256xf32>
    %77 = arith.addf %68, %76 : vector<8x256xf32>
    %78 = vector.extract_strided_slice %1 {offsets = [0, 6], sizes = [8, 1], strides = [1, 1]} : vector<8x11xf32> to vector<8x1xf32>
    %79 = vector.broadcast %78 : vector<8x1xf32> to vector<8x256xf32>
    %80 = arith.mulf %15, %79 : vector<8x256xf32>
    %81 = arith.addf %77, %80 : vector<8x256xf32>
    %c255_i32 = arith.constant 255 : i32
    %82 = tpu.dynamic_rotate %15 by %c255_i32 dim 1 : vector<8x256xf32>, i32 -> vector<8x256xf32>
    %cst_16 = arith.constant 0.000000e+00 : f32
    %83 = vector.shape_cast %40 : vector<1x256xi1> to vector<1x256xi1>
    %84 = vector.broadcast %83 : vector<1x256xi1> to vector<8x256xi1>
    %85 = vector.broadcast %cst_16 : f32 to vector<8x256xf32>
    %86 = arith.select %84, %82, %85 : vector<8x256xi1>, vector<8x256xf32>
    %87 = vector.extract_strided_slice %1 {offsets = [0, 7], sizes = [8, 1], strides = [1, 1]} : vector<8x11xf32> to vector<8x1xf32>
    %88 = vector.broadcast %87 : vector<8x1xf32> to vector<8x256xf32>
    %89 = arith.mulf %86, %88 : vector<8x256xf32>
    %90 = arith.addf %81, %89 : vector<8x256xf32>
    %c241_i32 = arith.constant 241 : i32
    %91 = tpu.dynamic_rotate %15 by %c241_i32 dim 1 : vector<8x256xf32>, i32 -> vector<8x256xf32>
    %92 = arith.andi %36, %38 : vector<1x256xi1>
    %cst_17 = arith.constant 0.000000e+00 : f32
    %93 = vector.shape_cast %92 : vector<1x256xi1> to vector<1x256xi1>
    %94 = vector.broadcast %93 : vector<1x256xi1> to vector<8x256xi1>
    %95 = vector.broadcast %cst_17 : f32 to vector<8x256xf32>
    %96 = arith.select %94, %91, %95 : vector<8x256xi1>, vector<8x256xf32>
    %97 = vector.extract_strided_slice %1 {offsets = [0, 8], sizes = [8, 1], strides = [1, 1]} : vector<8x11xf32> to vector<8x1xf32>
    %98 = vector.broadcast %97 : vector<8x1xf32> to vector<8x256xf32>
    %99 = arith.mulf %96, %98 : vector<8x256xf32>
    %100 = arith.addf %90, %99 : vector<8x256xf32>
    %c240_i32_18 = arith.constant 240 : i32
    %101 = tpu.dynamic_rotate %15 by %c240_i32_18 dim 1 : vector<8x256xf32>, i32 -> vector<8x256xf32>
    %cst_19 = arith.constant 0.000000e+00 : f32
    %102 = vector.shape_cast %36 : vector<1x256xi1> to vector<1x256xi1>
    %103 = vector.broadcast %102 : vector<1x256xi1> to vector<8x256xi1>
    %104 = vector.broadcast %cst_19 : f32 to vector<8x256xf32>
    %105 = arith.select %103, %101, %104 : vector<8x256xi1>, vector<8x256xf32>
    %106 = vector.extract_strided_slice %1 {offsets = [0, 9], sizes = [8, 1], strides = [1, 1]} : vector<8x11xf32> to vector<8x1xf32>
    %107 = vector.broadcast %106 : vector<8x1xf32> to vector<8x256xf32>
    %108 = arith.mulf %105, %107 : vector<8x256xf32>
    %109 = arith.addf %100, %108 : vector<8x256xf32>
    %c239_i32 = arith.constant 239 : i32
    %110 = tpu.dynamic_rotate %15 by %c239_i32 dim 1 : vector<8x256xf32>, i32 -> vector<8x256xf32>
    %111 = arith.andi %36, %40 : vector<1x256xi1>
    %cst_20 = arith.constant 0.000000e+00 : f32
    %112 = vector.shape_cast %111 : vector<1x256xi1> to vector<1x256xi1>
    %113 = vector.broadcast %112 : vector<1x256xi1> to vector<8x256xi1>
    %114 = vector.broadcast %cst_20 : f32 to vector<8x256xf32>
    %115 = arith.select %113, %110, %114 : vector<8x256xi1>, vector<8x256xf32>
    %116 = vector.extract_strided_slice %1 {offsets = [0, 10], sizes = [8, 1], strides = [1, 1]} : vector<8x11xf32> to vector<8x1xf32>
    %117 = vector.broadcast %116 : vector<8x1xf32> to vector<8x256xf32>
    %118 = arith.mulf %115, %117 : vector<8x256xf32>
    %119 = arith.addf %109, %118 : vector<8x256xf32>
    %c0_21 = arith.constant 0 : index
    %c0_22 = arith.constant 0 : index
    %120 = vector.load %arg3[%c0_21, %c0_22] : memref<8x256xf32, #tpu.memory_space<vmem>>, vector<8x256xf32>
    tpu.vector_store %arg3[%c0_21, %c0_22], %119 {strides = array<i32>} : memref<8x256xf32, #tpu.memory_space<vmem>>, vector<8x256xf32>,
    return
  }
  func.func @transform_0(%arg0: i32) -> (i32, i32) {
    %c0_i32 = arith.constant 0 : i32
    %c0_i32_0 = arith.constant 0 : i32
    return %arg0, %c0_i32 : i32, i32
  }
  func.func @transform_1(%arg0: i32) -> (i32, i32) {
    %c0_i32 = arith.constant 0 : i32
    %c0_i32_0 = arith.constant 0 : i32
    return %arg0, %c0_i32 : i32, i32
  }
  func.func @transform_2(%arg0: i32) -> (i32, i32) {
    %c0_i32 = arith.constant 0 : i32
    %c0_i32_0 = arith.constant 0 : i32
    return %arg0, %c0_i32 : i32, i32
  }
}

</mosaic_0001>

<bundles_post_ra>
// kernel: dwconv_block.1
= control target key start
LH: loop header
LB: loop body
LE: loop exit
PB: predicated region body
PF: predicated region fallthrough
CT: control target
= control target key end

     0   :  { %v375_v0 = vmov 0   ;;  %v376_v2 = vmov 1   ;;  %v377_v3 = vmov 6   ;;  %v378_v4 = vmov 2   ;;  %s386_s14 = smov 16   ;;  %s387_s15 = smov 17   ;;  %s592_s1 = inlined_call_operand.vmem [shape: f32[8,11], index: 1, kind: input, shape index: {}]   ;;  %s593_s0 = inlined_call_operand.vmem [shape: f32[8,256], index: 0, kind: input, shape index: {}]   ;;  %s594_s2 = inlined_call_operand.vmem [shape: f32[8,256], index: 2, kind: output, shape index: {}]  }
   0x1   :  { %359 = vset.pattern.permute.xlu0 %v375_v0  ;;  %v412_v1 = vld [vmem:[%s592_s1] sm:$0xff]  ;;  %361 = vset.pattern.permute.xlu2 %v378_v4  ;;  %v12_v7 = vld [vmem:[%s593_s0 + $0x8] sm:$0xff]  ;;  %v379_v8 = vmov 7   ;;  %v380_v9 = vmov 3   ;;  %v381_v19 = vmov 8   ;;  %v382_v20 = vmov 4  }
   0x2   :  { %16 = vperm.xlu0 %359, %v412_v1   ;;  %166 = vperm.xlu2 %361, %v412_v1   ;;  %v11_v6 = vld [vmem:[%s593_s0] sm:$0xff]  ;;  %v383_v37 = vmov 9   ;;  %v384_v38 = vmov 5   ;;  %s385_s0 = smov 15   ;;  %s388_s16 = smov 1  }
   0x3   :  { %366 = vset.pattern.permute.xlu1 %v379_v8  ;;  %s389_s17 = smov 127   ;;  %s391_s18 = smov 113  }
   0x4   :  { %258 = vperm.xlu1 %366, %v412_v1   ;;  %s392_s19 = smov 112   ;;  %s393_s20 = smov 111  }
   0xa   :  { %360 = vset.pattern.permute.xlu0 %v376_v2  ;;  %362 = vset.pattern.permute.xlu2 %v380_v9 }
   0xb   :  { %22 = vperm.xlu0 %360, %v412_v1   ;;  %185 = vperm.xlu2 %362, %v412_v1  }
   0xc   :  { %367 = vset.pattern.permute.xlu1 %v381_v19 }
   0xd   :  { %281 = vperm.xlu1 %367, %v412_v1  }
  0x13   :  { %365 = vset.pattern.permute.xlu0 %v377_v3  ;;  %363 = vset.pattern.permute.xlu2 %v382_v20 }
  0x14   :  { %237 = vperm.xlu0 %365, %v412_v1   ;;  %208 = vperm.xlu2 %363, %v412_v1  }
  0x15   :  { %368 = vset.pattern.permute.xlu1 %v383_v37 }
  0x16   :  { %302 = vperm.xlu1 %368, %v412_v1  }
  0x1c   :  { %364 = vset.pattern.permute.xlu2 %v384_v38 }
  0x1d   :  { %229 = vperm.xlu2 %364, %v412_v1  }
  0x74   :  { %v17_v5 = vpop.permute.xlu0 %16 }
  0x75   :  { %v19_v10 = vmul.f32 %v17_v5, %v11_v6  ;;  %v20_v11 = vmul.f32 %v17_v5, %v12_v7 }
  0x7d   :  { %v23_v12 = vpop.permute.xlu0 %22 }
  0x7e   :  { %v426_v13 = vadd.f32 %v23_v12, %v19_v10  ;;  %v428_v14 = vadd.f32 %v23_v12, %v20_v11 }
  0x80   :  { %v431_v15 = vmul.f32 0.70710677, %v426_v13  ;;  %v434_v16 = vmul.f32 0.70710677, %v428_v14 }
  0x82   :  { %v31_v17 = vmul.f32 %v431_v15, %v431_v15  ;;  %v71_v18 = vmul.f32 %v434_v16, %v434_v16 }
  0x84   :  { %v32_v21 = vmin.f32 %v31_v17, 16.0  ;;  %v72_v22 = vmin.f32 %v71_v18, 16.0 }
  0x86   :  { %v33_v23 = vmul.f32 2.1237322e-06, %v32_v21  ;;  %v44_v24 = vmul.f32 3.8918573e-05, %v32_v21  ;;  %v73_v25 = vmul.f32 2.1237322e-06, %v72_v22 }
  0x87   :  { %v84_v26 = vmul.f32 3.8918573e-05, %v72_v22 }
  0x88   :  { %v34_v27 = vadd.f32 0.00028619796, %v33_v23  ;;  %v45_v28 = vadd.f32 0.001143296, %v44_v24  ;;  %v74_v29 = vadd.f32 0.00028619796, %v73_v25 }
  0x89   :  { %v85_v30 = vadd.f32 0.001143296, %v84_v26 }
  0x8a   :  { %v35_v31 = vmul.f32 %v34_v27, %v32_v21  ;;  %v46_v32 = vmul.f32 %v45_v28, %v32_v21  ;;  %v75_v33 = vmul.f32 %v74_v29, %v72_v22 }
  0x8b   :  { %v86_v34 = vmul.f32 %v85_v30, %v72_v22 }
  0x8c   :  { %v36_v35 = vadd.f32 0.0036580483, %v35_v31  ;;  %v47_v36 = vadd.f32 0.014752088, %v46_v32  ;;  %v76_v41 = vadd.f32 0.0036580483, %v75_v33 }
  0x8d   :  { %v87_v39 = vadd.f32 0.014752088, %v86_v34  ;;  %v27_v31 = vmul.f32 0.5, %v426_v13  ;;  %v390_v13 = vmov 10  }
  0x8e   :  { %v48_v40 = vmul.f32 %v47_v36, %v32_v21  ;;  %v37_v43 = vmul.f32 %v36_v35, %v32_v21  ;;  %v77_v47 = vmul.f32 %v76_v41, %v72_v22  ;;  %369 = vset.pattern.permute.xlu1 %v390_v13  ;;  %370 = vset.pattern.permute.xlu0 %v390_v13  ;;  %v469_v36 = vpop.permute.xlu1 %258  ;;  %v475_v41 = vpop.permute.xlu0 %237 }
  0x8f   :  { %v88_v42 = vmul.f32 %v87_v39, %v72_v22 }
  0x90   :  { %v49_v44 = vadd.f32 0.112945676, %v48_v40  ;;  %v38_v49 = vadd.f32 0.05243302, %v37_v43  ;;  %v78_v53 = vadd.f32 0.05243302, %v77_v47  ;;  %v115_v47 = vlaneseq }
  0x91   :  { %v89_v45 = vadd.f32 0.112945676, %v88_v42 }
  0x92   :  { %v50_v46 = vmul.f32 %v49_v44, %v32_v21  ;;  %v39_v55 = vmul.f32 %v38_v49, %v32_v21  ;;  %v79_v58 = vmul.f32 %v78_v53, %v72_v22 }
  0x93   :  { %v90_v48 = vmul.f32 %v89_v45, %v72_v22 }
  0x94   :  { %v51_v50 = vadd.f32 0.4994258, %v50_v46  ;;  %v40_v59 = vadd.f32 0.18741608, %v39_v55  ;;  %v80_v60 = vadd.f32 0.18741608, %v79_v58 }
  0x95   :  { %v91_v51 = vadd.f32 0.4994258, %v90_v48 }
  0x96   :  { %v52_v52 = vmul.f32 %v51_v50, %v32_v21  ;;  %v41_v62 = vmul.f32 %v40_v59, %v32_v21  ;;  %v81_v4 = vmul.f32 %v80_v60, %v72_v22  ;;  %v471_v38 = vpop.permute.xlu1 %281 }
  0x97   :  { %v92_v54 = vmul.f32 %v91_v51, %v72_v22 }
  0x98   :  { %v53_v56 = vadd.f32 1.0, %v52_v52  ;;  %v42_v5 = vadd.f32 1.1283791, %v41_v62  ;;  %v82_v18 = vadd.f32 1.1283791, %v81_v4 }
  0x99   :  { %v93_v57 = vadd.f32 1.0, %v92_v54 }
  0x9a   :  { %371 = vrcp.f32 %v53_v56  ;;  %v65_v6 = vand.u32 2147483648, %v53_v56  ;;  %v63_v9 = vand.u32 2147483647, %v53_v56  ;;  %vm59_vm2 = vweird.f32 %v53_v56 }
  0x9b   :  { %373 = vrcp.f32 %v93_v57  ;;  %v105_v10 = vand.u32 2147483648, %v93_v57  ;;  %v103_v12 = vand.u32 2147483647, %v93_v57  ;;  %vm99_vm4 = vweird.f32 %v93_v57 }
  0x9c   :  { %v66_v19 = vor.u32 1.1754944e-38, %v65_v6  ;;  %v43_v21 = vmul.f32 %v42_v5, %v431_v15  ;;  %vm64_vm5 = vcmp.eq.f32.partialorder %v63_v9, 8.507059e+37  ;;  %v83_v27 = vmul.f32 %v82_v18, %v434_v16 }
  0x9d   :  { %v106_v23 = vor.u32 1.1754944e-38, %v105_v10  ;;  %vm104_vm7 = vcmp.eq.f32.partialorder %v103_v12, 8.507059e+37  ;;  %v28_v16 = vmul.f32 0.5, %v428_v14  ;;  %v167_v14 = vpop.permute.xlu2 %166 }
  0x9e   :  { %v473_v40 = vpop.permute.xlu1 %302 }
  0xa0   :  { %v372_v61 = vpop.eup %371 }
  0xa1   :  { %v374_v63 = vpop.eup %373  ;;  %v55_v0 = vmul.f32 %v372_v61, %v53_v56  ;;  %vm60_vm0 = vweird.f32 %v372_v61 }
  0xa2   :  { %v95_v2 = vmul.f32 %v374_v63, %v93_v57  ;;  %vm100_vm1 = vweird.f32 %v374_v63  ;;  %vm61_vm3 = vmor %vm59_vm2, %vm60_vm0 }
  0xa3   :  { %v56_v3 = vsub.f32 1.0, %v55_v0  ;;  %vm101_vm6 = vmor %vm99_vm4, %vm100_vm1 }
  0xa4   :  { %v96_v7 = vsub.f32 1.0, %v95_v2 }
  0xa5   :  { %v57_v8 = vmul.f32 %v372_v61, %v56_v3  ;;  %v186_v37 = vpop.permute.xlu2 %185 }
  0xa6   :  { %v97_v11 = vmul.f32 %v374_v63, %v96_v7 }
  0xa7   :  { %v58_v17 = vadd.f32 %v372_v61, %v57_v8 }
  0xa8   :  { %v98_v20 = vadd.f32 %v374_v63, %v97_v11 }
  0xa9   :  { %v62_v22 = vsel %vm61_vm3, %v372_v61, %v58_v17 }
  0xaa   :  { %v67_v24 = vsel %vm64_vm5, %v66_v19, %v62_v22  ;;  %v102_v25 = vsel %vm101_vm6, %v374_v63, %v98_v20 }
  0xab   :  { %v68_v26 = vmul.f32 %v67_v24, %v43_v21  ;;  %v107_v28 = vsel %vm104_vm7, %v106_v23, %v102_v25 }
  0xac   :  { %v108_v30 = vmul.f32 %v107_v28, %v83_v27 }
  0xad   :  { %v338_v29 = vclamps-f32 %v68_v26, 1.0  ;;  %v209_v39 = vpop.permute.xlu2 %208 }
  0xae   :  { %v339_v33 = vclamps-f32 %v108_v30, 1.0 }
  0xaf   :  { %v111_v32 = vadd.f32 1.0, %v338_v29 }
  0xb0   :  { %v112_v15 = vadd.f32 1.0, %v339_v33 }
  0xb1   :  { %v447_v34 = vmul.f32 %v111_v32, %v27_v31 }
  0xb2   :  { %v453_v35 = vmul.f32 %v112_v15, %v28_v16 }
  0xb3   :  { %192 = vrot.lane.b32.xlu0 %v447_v34, %s385_s0  ;;  %171 = vrot.lane.b32.xlu2 %v447_v34, %s386_s14 }
  0xb4   :  { %150 = vrot.lane.b32.xlu1 %v447_v34, %s387_s15 }
  0xb5   :  { %v230_v42 = vpop.permute.xlu2 %229 }
  0xbb   :  { %215 = vrot.lane.b32.xlu0 %v447_v34, %s388_s16  ;;  %246 = vrot.lane.b32.xlu2 %v453_v35, %s389_s17 }
  0xbc   :  { %152 = vrot.lane.b32.xlu1 %v453_v35, %s387_s15 }
  0xc3   :  { %267 = vrot.lane.b32.xlu0 %v453_v35, %s391_s18  ;;  %265 = vrot.lane.b32.xlu2 %v447_v34, %s391_s18 }
  0xc4   :  { %173 = vrot.lane.b32.xlu1 %v453_v35, %s386_s14 }
  0xcb   :  { %290 = vrot.lane.b32.xlu0 %v453_v35, %s392_s19  ;;  %288 = vrot.lane.b32.xlu2 %v447_v34, %s392_s19 }
  0xcc   :  { %194 = vrot.lane.b32.xlu1 %v453_v35, %s385_s0 }
  0xd3   :  { %311 = vrot.lane.b32.xlu0 %v453_v35, %s393_s20  ;;  %309 = vrot.lane.b32.xlu2 %v447_v34, %s393_s20 }
  0xd4   :  { %217 = vrot.lane.b32.xlu1 %v453_v35, %s388_s16 }
  0xdc   :  { %244 = vrot.lane.b32.xlu1 %v447_v34, %s389_s17 }
  0xe4   :  { %325 = vperm.xlu1 %369, %v412_v1   ;;  %v479_v1 = vand.u32 127, %v115_v47 }
  0xe6   :  { %v482_v51 = vadd.s32 128, %v479_v1  ;;  %v122_v52 = vand.u32 15, %v479_v1  ;;  %vm175_vm8 = vcmp.lt.s32.totalorder %v479_v1, 16  ;;  %vm142_vm9 = vcmp.ge.s32.totalorder %v479_v1, 16 }
  0xe7   :  { %vm154_vm11 = vcmp.lt.s32.totalorder %v479_v1, 17  ;;  %vm196_vm13 = vcmp.lt.s32.totalorder %v479_v1, 15  ;;  %vm219_vm2 = vcmp.lt.s32.totalorder %v479_v1, 1  ;;  %vm269_vm4 = vcmp.lt.s32.totalorder %v479_v1, 113 }
  0xe8   :  { %v129_v53 = vand.u32 15, %v482_v51  ;;  %vm488_vm10 = vcmp.ge.s32.totalorder %v122_v52, 1  ;;  %vm493_vm12 = vcmp.le.s32.totalorder %v122_v52, 14  ;;  %vm145_vm3 = vcmp.lt.s32.totalorder %v482_v51, 240 }
  0xe9   :  { %vm508_vm15 = vmand %vm142_vm9, %vm488_vm10  ;;  %vm292_vm6 = vcmp.lt.s32.totalorder %v479_v1, 112  ;;  %vm248_vm7 = vcmp.lt.s32.totalorder %v479_v1, 127 }
  0xea   :  { %vm500_vm14 = vcmp.ge.s32.totalorder %v129_v53, 1  ;;  %vm512_vm0 = vcmp.le.s32.totalorder %v129_v53, 14  ;;  %vm520_vm1 = vmand %vm142_vm9, %vm493_vm12 }
  0xeb   :  { %vm547_vm5 = vmand %vm145_vm3, %vm500_vm14 }
 0x10d   :  { %v172_v45 = vpop.permute.xlu2 %171 }
 0x115   :  { %v477_v49 = vpop.permute.xlu2 %246 }
 0x11d   :  { %v266_v56 = vpop.permute.xlu2 %265 }
 0x125   :  { %v193_v44 = vpop.permute.xlu0 %192  ;;  %v289_v25 = vpop.permute.xlu2 %288 }
 0x126   :  { %v151_v43 = vpop.permute.xlu1 %150 }
 0x12d   :  { %v216_v48 = vpop.permute.xlu0 %215  ;;  %v310_v55 = vpop.permute.xlu2 %309 }
 0x12e   :  { %v153_v46 = vpop.permute.xlu1 %152 }
 0x12f   :  { %v155_v62 = vsel %vm154_vm11, %v151_v43, %v153_v46  ;;  %v156_v63 = vsel %vm154_vm11, %v153_v46, %v151_v43 }
 0x130   :  { %v163_v7 = vsel %vm508_vm15, %v156_v63, 0.0  ;;  %v164_v8 = vsel %vm500_vm14, %v155_v62, 0.0 }
 0x131   :  { %v169_v17 = vmul.f32 %v167_v14, %v163_v7  ;;  %v170_v18 = vmul.f32 %v167_v14, %v164_v8 }
 0x135   :  { %v268_v54 = vpop.permute.xlu0 %267 }
 0x136   :  { %v174_v50 = vpop.permute.xlu1 %173  ;;  %v270_v32 = vsel %vm269_vm4, %v266_v56, %v268_v54  ;;  %v271_v13 = vsel %vm269_vm4, %v268_v54, %v266_v56 }
 0x137   :  { %v177_v59 = vsel %vm175_vm8, %v174_v50, %v172_v45  ;;  %v176_v5 = vsel %vm175_vm8, %v172_v45, %v174_v50  ;;  %v278_v43 = vsel %vm488_vm10, %v270_v32, 0.0  ;;  %v279_v45 = vsel %vm547_vm5, %v271_v13, 0.0 }
 0x138   :  { %v182_v6 = vsel %vm142_vm9, %v177_v59, 0.0  ;;  %v189_v12 = vmul.f32 %v186_v37, %v176_v5  ;;  %vm313_vm8 = vcmp.lt.s32.totalorder %v479_v1, 111  ;;  %v284_v56 = vmul.f32 %v471_v38, %v278_v43  ;;  %vm317_vm9 = vmand %vm145_vm3, %vm512_vm0 }
 0x139   :  { %v188_v11 = vmul.f32 %v186_v37, %v182_v6 }
 0x13a   :  { %v191_v29 = vadd.f32 %v189_v12, %v170_v18 }
 0x13b   :  { %v190_v28 = vadd.f32 %v188_v11, %v169_v17 }
 0x13d   :  { %v291_v19 = vpop.permute.xlu0 %290 }
 0x13e   :  { %v195_v58 = vpop.permute.xlu1 %194  ;;  %v294_v46 = vsel %vm292_vm6, %v291_v19, %v289_v25 }
 0x13f   :  { %v197_v3 = vsel %vm196_vm13, %v193_v44, %v195_v58  ;;  %v198_v4 = vsel %vm196_vm13, %v195_v58, %v193_v44  ;;  %v293_v58 = vsel %vm292_vm6, %v289_v25, %v291_v19  ;;  %v300_v59 = vsel %vm145_vm3, %v294_v46, 0.0 }
 0x140   :  { %v205_v9 = vsel %vm520_vm1, %v198_v4, 0.0  ;;  %v206_v10 = vsel %vm512_vm0, %v197_v3, 0.0  ;;  %v306_v2 = vmul.f32 %v473_v40, %v300_v59 }
 0x141   :  { %v211_v21 = vmul.f32 %v209_v39, %v205_v9  ;;  %v212_v22 = vmul.f32 %v209_v39, %v206_v10  ;;  %v240_v39 = vmul.f32 %v475_v41, %v447_v34 }
 0x143   :  { %v213_v33 = vadd.f32 %v211_v21, %v190_v28  ;;  %v214_v15 = vadd.f32 %v212_v22, %v191_v29 }
 0x145   :  { %v312_v34 = vpop.permute.xlu0 %311 }
 0x146   :  { %v218_v20 = vpop.permute.xlu1 %217  ;;  %v314_v60 = vsel %vm313_vm8, %v310_v55, %v312_v34  ;;  %v315_v61 = vsel %vm313_vm8, %v312_v34, %v310_v55 }
 0x147   :  { %v220_v23 = vsel %vm219_vm2, %v216_v48, %v218_v20  ;;  %v221_v24 = vsel %vm219_vm2, %v218_v20, %v216_v48  ;;  %v322_v1 = vsel %vm493_vm12, %v314_v60, 0.0  ;;  %v323_v4 = vsel %vm317_vm9, %v315_v61, 0.0 }
 0x148   :  { %v226_v26 = vsel %vm488_vm10, %v221_v24, 0.0  ;;  %v227_v27 = vsel %vm500_vm14, %v220_v23, 0.0 }
 0x149   :  { %v232_v30 = vmul.f32 %v230_v42, %v226_v26  ;;  %v233_v31 = vmul.f32 %v230_v42, %v227_v27  ;;  %v241_v42 = vmul.f32 %v475_v41, %v453_v35 }
 0x14b   :  { %v234_v14 = vadd.f32 %v232_v30, %v213_v33  ;;  %v235_v37 = vadd.f32 %v233_v31, %v214_v15 }
 0x14d   :  { %v243_v50 = vadd.f32 %v241_v42, %v235_v37  ;;  %v242_v52 = vadd.f32 %v240_v39, %v234_v14 }
 0x14e   :  { %v245_v44 = vpop.permute.xlu1 %244 }
 0x14f   :  { %v249_v47 = vsel %vm248_vm7, %v245_v44, %v477_v49  ;;  %v250_v48 = vsel %vm248_vm7, %v477_v49, %v245_v44  ;;  %v285_v49 = vmul.f32 %v471_v38, %v279_v45 }
 0x150   :  { %v255_v35 = vsel %vm493_vm12, %v249_v47, 0.0  ;;  %v256_v41 = vsel %vm512_vm0, %v250_v48, 0.0 }
 0x151   :  { %v261_v53 = vmul.f32 %v469_v36, %v255_v35  ;;  %v262_v54 = vmul.f32 %v469_v36, %v256_v41  ;;  %v305_v36 = vmul.f32 %v473_v40, %v293_v58 }
 0x153   :  { %v263_v62 = vadd.f32 %v261_v53, %v242_v52  ;;  %v264_v63 = vadd.f32 %v262_v54, %v243_v50 }
 0x155   :  { %v287_v38 = vadd.f32 %v285_v49, %v264_v63  ;;  %v286_v3 = vadd.f32 %v284_v56, %v263_v62 }
 0x156   :  { %v326_v5 = vpop.permute.xlu1 %325 }
 0x157   :  { %v308_v6 = vadd.f32 %v306_v2, %v287_v38  ;;  %v307_v7 = vadd.f32 %v305_v36, %v286_v3  ;;  %v328_v8 = vmul.f32 %v326_v5, %v322_v1  ;;  %v329_v9 = vmul.f32 %v326_v5, %v323_v4 }
 0x159   :  { %v330_v10 = vadd.f32 %v328_v8, %v307_v7  ;;  %v331_v0 = vadd.f32 %v329_v9, %v308_v6 }
 0x15b   :  { %332 = vst [vmem:[%s594_s2] sm:$0xff] %v330_v10 }
 0x15c   :  { %333 = vst [vmem:[%s594_s2 + $0x8] sm:$0xff] %v331_v0 }

</bundles_post_ra>
